<compile_context>
chip_gen: v7x
topology: tpu7x:2x2x1
jax: 0.10.0
libtpu: 0.0.40
codegen_flags: <defaults>
</compile_context>

<pallas_src>
import functools

import jax
import jax.numpy as jnp
from jax.experimental import pallas as pl
from jax.experimental.pallas import tpu as pltpu

# Logical dims (PyTorch module) and lane-padded dims.
K_IN, K_PAD = 120, 128      # decoder input dim
H, H_PAD = 300, 384         # hidden dim
OUT, OUT_PAD = 784, 896     # output dim (28*28)


def _round_up(x, m):
    return ((x + m - 1) // m) * m


def _decoder_kernel(x_ref, w1_ref, b1_ref, w2_ref, b2_ref, o_ref):
    # x_ref : (TB, 128)  bf16      w1_ref: (128, 384) bf16   b1_ref: (1, 384) f32
    # w2_ref: (384, 896) bf16      b2_ref: (1, 896)   f32    o_ref : (TB, 896) f32
    x = x_ref[...]

    # Layer 1: bf16 matmul, f32 accumulate, bias + ReLU in f32.
    h = jnp.dot(x, w1_ref[...], preferred_element_type=jnp.float32) + b1_ref[...]
    h = jnp.maximum(h, 0.0)

    # Layer 2: bf16 matmul, f32 accumulate, bias in f32.
    y = jnp.dot(h.astype(jnp.bfloat16), w2_ref[...],
                preferred_element_type=jnp.float32) + b2_ref[...]

    # sigmoid(y) = 1 / (1 + exp(-y)); exp -> EUP, approx reciprocal -> EUP.
    o_ref[...] = pl.reciprocal(1.0 + jnp.exp(-y), approx=True).astype(o_ref.dtype)


def prepare_decoder_params(weight1, bias1, weight2, bias2):
    """One-time prep: transpose to (in, out), zero-pad to lane multiples, cast to bf16.

    weight1: (300, 120), bias1: (300,), weight2: (784, 300), bias2: (784,)  (PyTorch layout)
    """
    w1 = jnp.zeros((K_PAD, H_PAD), jnp.float32).at[:K_IN, :H].set(weight1.T.astype(jnp.float32))
    b1 = jnp.zeros((1, H_PAD), jnp.float32).at[:, :H].set(bias1.astype(jnp.float32))
    w2 = jnp.zeros((H_PAD, OUT_PAD), jnp.float32).at[:H, :OUT].set(weight2.T.astype(jnp.float32))
    b2 = jnp.zeros((1, OUT_PAD), jnp.float32).at[:, :OUT].set(bias2.astype(jnp.float32))
    return (w1.astype(jnp.bfloat16), b1, w2.astype(jnp.bfloat16), b2)


@functools.partial(jax.jit, static_argnames=("block_b",))
def decoder_forward(dec_input, params, *, block_b=512):
    """Pallas implementation of Decoder.forward.

    dec_input: (B, 120) float32
    params:    output of prepare_decoder_params(...)
    returns:   (B, 1, 28, 28) float32
    """
    w1p, b1p, w2p, b2p = params
    B = dec_input.shape[0]

    # Batch tile: multiple of 8 sublanes (16 for bf16 when tiled); for tiny B
    # just take the whole (padded) batch in one block.
    TB = min(block_b, _round_up(B, 16))
    B_pad = _round_up(B, TB)

    # Zero-pad input batch/feature dims; cast matmul operand to bf16 once here.
    x_pad = jnp.zeros((B_pad, K_PAD), jnp.float32).at[:B, :K_IN].set(
        dec_input.astype(jnp.float32)).astype(jnp.bfloat16)

    grid = (B_pad // TB,)

    out_pad = pl.pallas_call(
        _decoder_kernel,
        out_shape=jax.ShapeDtypeStruct((B_pad, OUT_PAD), jnp.float32),
        grid=grid,
        in_specs=[
            pl.BlockSpec((TB, K_PAD), lambda i: (i, 0)),        # x tile (pipelined)
            pl.BlockSpec((K_PAD, H_PAD), lambda i: (0, 0)),     # w1 resident
            pl.BlockSpec((1, H_PAD), lambda i: (0, 0)),         # b1 resident
            pl.BlockSpec((H_PAD, OUT_PAD), lambda i: (0, 0)),   # w2 resident
            pl.BlockSpec((1, OUT_PAD), lambda i: (0, 0)),       # b2 resident
        ],
        out_specs=pl.BlockSpec((TB, OUT_PAD), lambda i: (i, 0)),
        compiler_params=pltpu.CompilerParams(
            dimension_semantics=("parallel",),
        ),
    )(x_pad, w1p, b1p, w2p, b2p)

    return out_pad[:B, :OUT].reshape(B, 1, 28, 28)


def _reference_forward(dec_input, weight1, bias1, weight2, bias2):
    h = jnp.maximum(dec_input @ weight1.T + bias1, 0.0)
    y = jax.nn.sigmoid(h @ weight2.T + bias2)
    return y.reshape(-1, 1, 28, 28)


if __name__ == "__main__":
    key = jax.random.PRNGKey(0)
    k_x, k_w1, k_w2 = jax.random.split(key, 3)

    B = 8
    dec_input = jax.random.normal(k_x, (B, K_IN), dtype=jnp.float32)

    # Deterministic synthetic parameters (shapes from the module's __init__ /
    # init_weights: weight1 = shared[1].T -> (300,120); weight2 = shared[0].T -> (784,300)).
    weight1 = jax.random.normal(k_w1, (H, K_IN), dtype=jnp.float32) * 0.05
    weight2 = jax.random.normal(k_w2, (OUT, H), dtype=jnp.float32) * 0.05
    bias1 = jnp.full((H,), 0.01, dtype=jnp.float32)    # bias1.data.fill_(0.01)
    bias2 = jnp.full((OUT,), 0.01, dtype=jnp.float32)  # bias2.data.fill_(0.01)

    # One-time weight prep (hoisted out of the per-call path).
    params = prepare_decoder_params(weight1, bias1, weight2, bias2)

    out = decoder_forward(dec_input, params)
    out = jax.block_until_ready(out)

    ref = _reference_forward(dec_input, weight1, bias1, weight2, bias2)
    assert out.shape == (B, 1, 28, 28), out.shape
    # bf16 matmul inputs + approx reciprocal => compare at a relaxed tolerance.
    assert jnp.allclose(out, ref, atol=2e-2, rtol=0.0), (
        "mismatch vs reference; max abs diff = %s" % float(jnp.max(jnp.abs(out - ref))))

    print("KERNEL_OK")
</pallas_src>

<mosaic_0001>
module attributes {stable_mosaic.version = 11 : i64} {
  func.func @_decoder_kernel(%arg0: i32, %arg1: memref<16x128xbf16, #tpu.memory_space<vmem>>, %arg2: memref<128x384xbf16, #tpu.memory_space<vmem>>, %arg3: memref<1x384xf32, #tpu.memory_space<vmem>>, %arg4: memref<384x896xbf16, #tpu.memory_space<vmem>>, %arg5: memref<1x896xf32, #tpu.memory_space<vmem>>, %arg6: memref<16x896xf32, #tpu.memory_space<vmem>>) attributes {dimension_semantics = [#tpu.dimension_semantics<parallel>], iteration_bounds = array<i64: 1>, scalar_prefetch = 0 : i64, scratch_operands = 0 : i64, tpu.core_type = #tpu.core_type<tc>, window_params = [{transform_indices = @transform_0, window_bounds = array<i64: 16, 128>}, {pipeline_mode = #tpu.pipeline_mode<synchronous>, transform_indices = @transform_1, window_bounds = array<i64: 128, 384>}, {pipeline_mode = #tpu.pipeline_mode<synchronous>, transform_indices = @transform_2, window_bounds = array<i64: 1, 384>}, {pipeline_mode = #tpu.pipeline_mode<synchronous>, transform_indices = @transform_3, window_bounds = array<i64: 384, 896>}, {pipeline_mode = #tpu.pipeline_mode<synchronous>, transform_indices = @transform_4, window_bounds = array<i64: 1, 896>}, {transform_indices = @transform_5, window_bounds = array<i64: 16, 896>}]} {
    %c0 = arith.constant 0 : index
    %c0_0 = arith.constant 0 : index
    %0 = vector.load %arg1[%c0, %c0_0] : memref<16x128xbf16, #tpu.memory_space<vmem>>, vector<16x128xbf16>
    %c0_1 = arith.constant 0 : index
    %c0_2 = arith.constant 0 : index
    %1 = vector.load %arg2[%c0_1, %c0_2] : memref<128x384xbf16, #tpu.memory_space<vmem>>, vector<128x384xbf16>
    %cst = arith.constant dense<0.000000e+00> : vector<16x384xf32>
    %2 = tpu.matmul %0, %1, %cst {dimension_numbers = #tpu.dot_dimension_numbers<[1], [0], [0], [1], [0, 0, 1, 1], [], []>} : vector<16x128xbf16>, vector<128x384xbf16>, vector<16x384xf32> -> vector<16x384xf32>
    %c0_3 = arith.constant 0 : index
    %c0_4 = arith.constant 0 : index
    %3 = vector.load %arg3[%c0_3, %c0_4] : memref<1x384xf32, #tpu.memory_space<vmem>>, vector<1x384xf32>
    %4 = vector.broadcast %3 : vector<1x384xf32> to vector<16x384xf32>
    %5 = arith.addf %2, %4 : vector<16x384xf32>
    %cst_5 = arith.constant 0.000000e+00 : f32
    %6 = vector.broadcast %cst_5 : f32 to vector<16x384xf32>
    %7 = arith.maximumf %5, %6 : vector<16x384xf32>
    %8 = arith.truncf %7 : vector<16x384xf32> to vector<16x384xbf16>
    %c0_6 = arith.constant 0 : index
    %c0_7 = arith.constant 0 : index
    %9 = vector.load %arg4[%c0_6, %c0_7] : memref<384x896xbf16, #tpu.memory_space<vmem>>, vector<384x896xbf16>
    %cst_8 = arith.constant dense<0.000000e+00> : vector<16x896xf32>
    %10 = tpu.matmul %8, %9, %cst_8 {dimension_numbers = #tpu.dot_dimension_numbers<[1], [0], [0], [1], [0, 0, 1, 1], [], []>} : vector<16x384xbf16>, vector<384x896xbf16>, vector<16x896xf32> -> vector<16x896xf32>
    %c0_9 = arith.constant 0 : index
    %c0_10 = arith.constant 0 : index
    %11 = vector.load %arg5[%c0_9, %c0_10] : memref<1x896xf32, #tpu.memory_space<vmem>>, vector<1x896xf32>
    %12 = vector.broadcast %11 : vector<1x896xf32> to vector<16x896xf32>
    %13 = arith.addf %10, %12 : vector<16x896xf32>
    %cst_11 = arith.constant 0.000000e+00 : f32
    %14 = vector.broadcast %cst_11 : f32 to vector<16x896xf32>
    %15 = arith.subf %14, %13 : vector<16x896xf32>
    %16 = math.exp %15 : vector<16x896xf32>
    %cst_12 = arith.constant 1.000000e+00 : f32
    %17 = vector.broadcast %cst_12 : f32 to vector<16x896xf32>
    %18 = arith.addf %17, %16 : vector<16x896xf32>
    %19 = tpu.reciprocal %18 {approx = true} : vector<16x896xf32> -> vector<16x896xf32>
    %c0_13 = arith.constant 0 : index
    %c0_14 = arith.constant 0 : index
    %20 = vector.load %arg6[%c0_13, %c0_14] : memref<16x896xf32, #tpu.memory_space<vmem>>, vector<16x896xf32>
    tpu.vector_store %arg6[%c0_13, %c0_14], %19 {strides = array<i32>} : memref<16x896xf32, #tpu.memory_space<vmem>>, vector<16x896xf32>,
    return
  }
  func.func @transform_0(%arg0: i32) -> (i32, i32) {
    %c0_i32 = arith.constant 0 : i32
    %c0_i32_0 = arith.constant 0 : i32
    return %arg0, %c0_i32 : i32, i32
  }
  func.func @transform_1(%arg0: i32) -> (i32, i32) {
    %c0_i32 = arith.constant 0 : i32
    %c0_i32_0 = arith.constant 0 : i32
    %c0_i32_1 = arith.constant 0 : i32
    return %c0_i32, %c0_i32_0 : i32, i32
  }
  func.func @transform_2(%arg0: i32) -> (i32, i32) {
    %c0_i32 = arith.constant 0 : i32
    %c0_i32_0 = arith.constant 0 : i32
    %c0_i32_1 = arith.constant 0 : i32
    return %c0_i32, %c0_i32_0 : i32, i32
  }
  func.func @transform_3(%arg0: i32) -> (i32, i32) {
    %c0_i32 = arith.constant 0 : i32
    %c0_i32_0 = arith.constant 0 : i32
    %c0_i32_1 = arith.constant 0 : i32
    return %c0_i32, %c0_i32_0 : i32, i32
  }
  func.func @transform_4(%arg0: i32) -> (i32, i32) {
    %c0_i32 = arith.constant 0 : i32
    %c0_i32_0 = arith.constant 0 : i32
    %c0_i32_1 = arith.constant 0 : i32
    return %c0_i32, %c0_i32_0 : i32, i32
  }
  func.func @transform_5(%arg0: i32) -> (i32, i32) {
    %c0_i32 = arith.constant 0 : i32
    %c0_i32_0 = arith.constant 0 : i32
    return %arg0, %c0_i32 : i32, i32
  }
}

</mosaic_0001>

<bundles_post_ra>
// kernel: decoder_forward.1
= control target key start
LH: loop header
LB: loop body
LE: loop exit
PB: predicated region body
PF: predicated region fallthrough
CT: control target
= control target key end

     0   :  { %10 = vsyncpa [#allocation3], 0  ;;  %s2719_s0 = inlined_call_operand.vmem [shape: bf16[16,128], index: 0, kind: input, shape index: {}]   ;;  %s2720_s1 = inlined_call_operand.hbm [shape: bf16[128,384], index: 1, kind: input, shape index: {}]   ;;  %s2721_s2 = inlined_call_operand.vmem [shape: f32[1,384], index: 2, kind: input, shape index: {}]   ;;  %s2722_s3 = inlined_call_operand.hbm [shape: bf16[384,896], index: 3, kind: input, shape index: {}]   ;;  %s2723_s4 = inlined_call_operand.vmem [shape: f32[1,896], index: 4, kind: input, shape index: {}]   ;;  %s2724_s5 = inlined_call_operand.vmem [shape: f32[16,896], index: 5, kind: output, shape index: {}]  }
   0x1   :  { %11 = vsyncpa [#allocation5], 0  ;;  %s2533_s18 = smov [#allocation2]   ;;  %s2485_s22 = scalar_lea.hbm %s2720_s1, 3072 }
   0x2   :  { %s19_s19 = sshll.u32 %s2533_s18, 4  ;;  %p2486_p0 = scmp.ne.s32.totalorder %s2720_s1, %s2485_s22  ;;  %s20_s19 = int_to_ptr.vmem [resolvable:$true] %s19_s19 }
   0x3   :  { %p2489_p1 = scmp.lt.u32.totalorder %s2485_s22, %s2720_s1 }
   0x5   :  { %p2491_p2 = pnand %p2489_p1, %p2486_p0 }
   0x7   :  { %2494 = shalt.err (!%p2491_p2)
}
   0x8   :  { %s2495_s27 = scalar_lea.vmem %s20_s19, 3072  ;;  %p2500_p4 = scmp.lt.s32.totalorder %s20_s19, %s20_s19 }
   0x9   :  { %p2496_p3 = scmp.ne.s32.totalorder %s20_s19, %s2495_s27  ;;  %p2501_p5 = scmp.lt.s32.totalorder %s2495_s27, %s2495_s27 }
   0xb   :  { %p2502_p6 = por %p2501_p5, %p2500_p4 }
   0xd   :  { %p2503_p7 = pnand %p2502_p6, %p2496_p3 }
   0xf   :  { %2506 = shalt.err (!%p2503_p7)
}
  0x10   :  { %s2534_s28 = smov 192   ;;  %s2535_s29 = smov 12  }
  0x11   :  { %25 = dma.hbm_to_vmem [thread:$0]  %s2720_s1, 3072, %s20_s19, [#allocation3], %s2534_s28, %s2534_s28, %s2535_s29  }
  0x12   :  { %s2536_s7 = smov [#allocation4]   ;;  %s2507_s11 = scalar_lea.hbm %s2722_s3, 21504 }
  0x13   :  { %s33_s8 = sshll.u32 %s2536_s7, 4  ;;  %p2508_p8 = scmp.ne.s32.totalorder %s2722_s3, %s2507_s11  ;;  %s34_s8 = int_to_ptr.vmem [resolvable:$true] %s33_s8 }
  0x14   :  { %p2511_p9 = scmp.lt.u32.totalorder %s2507_s11, %s2722_s3 }
  0x16   :  { %p2513_p10 = pnand %p2511_p9, %p2508_p8 }
  0x18   :  { %2516 = shalt.err (!%p2513_p10)
}
  0x19   :  { %s2517_s16 = scalar_lea.vmem %s34_s8, 21504  ;;  %p2522_p12 = scmp.lt.s32.totalorder %s34_s8, %s34_s8 }
  0x1a   :  { %p2518_p11 = scmp.ne.s32.totalorder %s34_s8, %s2517_s16  ;;  %p2523_p13 = scmp.lt.s32.totalorder %s2517_s16, %s2517_s16 }
  0x1c   :  { %p2524_p0 = por %p2523_p13, %p2522_p12 }
  0x1e   :  { %p2525_p1 = pnand %p2524_p0, %p2518_p11 }
  0x20   :  { %2528 = shalt.err (!%p2525_p1)
}
  0x21   :  { %s2537_s1 = smov 448   ;;  %s2538_s17 = smov 28  }
  0x22   :  { %39 = dma.hbm_to_vmem [thread:$0]  %s2722_s3, 21504, %s34_s8, [#allocation5], %s2537_s1, %s2537_s1, %s2538_s17  }
  0x23   :  { %2529 = dma.done.wait [#allocation3], 3072  }
  0x24   :  { %2530 = vsyncadd [#allocation3], 4294964224 }
  0x25   :  { %2531 = dma.done.wait [#allocation5], 21504  }
  0x26   :  { %2532 = vsyncadd [#allocation5], 4294945792  ;;  %v2539_v0 = vmov 0   ;;  %v2540_v1 = vmov 0.0   ;;  %vm2541_vm0 = vmmov 0   ;;  %v2180_v24 = vld [vmem:[%s2719_s0] sm:$0xff]  }
  0x27   :  { %266 = vmatprep.mubr.bf16.mxu0 %v2539_v0  ;;  %2083 = vmatprep.subr.bf16.mxu1 %v2540_v1  ;;  %v2156_v2 = vld [vmem:[#allocation2 + $0x4] ss:$12 sps:$4 sm:$0xff]   ;;  %v2158_v3 = vld [vmem:[#allocation2] ss:$12 sps:$4 sm:$0xff]   ;;  %v2159_v4 = vld [vmem:[#allocation2 + $0x1c] ss:$12 sps:$4 sm:$0xff]  }
  0x28   :  { %2099 = vmatprep.mubr.msk.bf16.mxu1 %vm2541_vm0, %v2540_v1  ;;  %234 = vmatprep.subr.bf16.mxu0 %v2156_v2  ;;  %v2161_v5 = vld [vmem:[#allocation2 + $0x18] ss:$12 sps:$4 sm:$0xff]   ;;  %v2162_v6 = vld [vmem:[#allocation2 + $0x34] ss:$12 sps:$4 sm:$0xff]   ;;  %v2164_v7 = vld [vmem:[#allocation2 + $0x30] ss:$12 sps:$4 sm:$0xff]  }
  0x29   :  { %235 = vmatpush1.bf16.msra.mxu0 %v2158_v3  ;;  %v2165_v8 = vld [vmem:[#allocation2 + $0x4c] ss:$12 sps:$4 sm:$0xff]   ;;  %v2167_v9 = vld [vmem:[#allocation2 + $0x48] ss:$12 sps:$4 sm:$0xff]   ;;  %v2168_v10 = vld [vmem:[#allocation2 + $0x64] ss:$12 sps:$4 sm:$0xff]  }
  0x2a   :  { %236 = vmatprep.subr.bf16.mxu0 %v2159_v4  ;;  %v2181_v11 = vld [vmem:[#allocation2 + $0x8] ss:$12 sps:$4 sm:$0xff]   ;;  %v2182_v12 = vld [vmem:[#allocation2 + $0x20] ss:$12 sps:$4 sm:$0xff]   ;;  %v2183_v15 = vld [vmem:[#allocation2 + $0x38] ss:$12 sps:$4 sm:$0xff]  }
  0x2b   :  { %2084 = vmatpush3.bf16.msra.mxu1 %v2181_v11  ;;  %v2170_v13 = vld [vmem:[#allocation2 + $0x60] ss:$12 sps:$4 sm:$0xff]   ;;  %v2171_v14 = vld [vmem:[#allocation2 + $0x7c] ss:$12 sps:$4 sm:$0xff]   ;;  %v2173_v16 = vld [vmem:[#allocation2 + $0x78] ss:$12 sps:$4 sm:$0xff]  }
  0x2c   :  { %2085 = vmatprep.subr.bf16.mxu1 %v2540_v1  ;;  %v2174_v17 = vld [vmem:[#allocation2 + $0x94] ss:$12 sps:$4 sm:$0xff]   ;;  %v2184_v18 = vld [vmem:[#allocation2 + $0x50] ss:$12 sps:$4 sm:$0xff]   ;;  %v2177_v20 = vld [vmem:[#allocation2 + $0xac] ss:$12 sps:$4 sm:$0xff]  }
  0x2d   :  { %237 = vmatpush1.bf16.msra.mxu0 %v2161_v5  ;;  %v2176_v19 = vld [vmem:[#allocation2 + $0x90] ss:$12 sps:$4 sm:$0xff]   ;;  %v2185_v21 = vld [vmem:[#allocation2 + $0x68] ss:$12 sps:$4 sm:$0xff]   ;;  %v2191_v23 = vld [vmem:[#allocation4 + $0x4] ss:$28 sps:$4 sm:$0xff]  }
  0x2e   :  { %238 = vmatprep.subr.bf16.mxu0 %v2162_v6  ;;  %v2179_v22 = vld [vmem:[#allocation2 + $0xa8] ss:$12 sps:$4 sm:$0xff]   ;;  %v2186_v25 = vld [vmem:[#allocation2 + $0x80] ss:$12 sps:$4 sm:$0xff]   ;;  %v2197_v27 = vld [vmem:[#allocation4 + $0x3c] ss:$28 sps:$4 sm:$0xff]  }
  0x2f   :  { %2086 = vmatpush3.bf16.msra.mxu1 %v2182_v12  ;;  %v2189_v26 = vld [vmem:[#allocation4] ss:$28 sps:$4 sm:$0xff]   ;;  %v2187_v28 = vld [vmem:[#allocation2 + $0x98] ss:$12 sps:$4 sm:$0xff]   ;;  %v2203_v30 = vld [vmem:[#allocation4 + $0x74] ss:$28 sps:$4 sm:$0xff]  }
  0x30   :  { %2087 = vmatprep.subr.bf16.mxu1 %v2540_v1  ;;  %v2195_v29 = vld [vmem:[#allocation4 + $0x38] ss:$28 sps:$4 sm:$0xff]   ;;  %v2188_v31 = vld [vmem:[#allocation2 + $0xb0] ss:$12 sps:$4 sm:$0xff]   ;;  %v2194_v32 = vld [vmem:[#allocation4 + $0xc] ss:$28 sps:$4 sm:$0xff]  }
  0x31   :  { %239 = vmatpush1.bf16.msra.mxu0 %v2164_v7  ;;  %v2201_v33 = vld [vmem:[#allocation4 + $0x70] ss:$28 sps:$4 sm:$0xff]   ;;  %v2192_v35 = vld [vmem:[#allocation4 + $0x8] ss:$28 sps:$4 sm:$0xff]   ;;  %v2198_v39 = vld [vmem:[#allocation4 + $0x40] ss:$28 sps:$4 sm:$0xff]  }
  0x32   :  { %240 = vmatprep.subr.bf16.mxu0 %v2165_v8  ;;  %v2209_v34 = vld [vmem:[#allocation4 + $0xac] ss:$28 sps:$4 sm:$0xff]   ;;  %v2200_v36 = vld [vmem:[#allocation4 + $0x44] ss:$28 sps:$4 sm:$0xff]   ;;  %v2206_v40 = vld [vmem:[#allocation4 + $0x7c] ss:$28 sps:$4 sm:$0xff]  }
  0x33   :  { %2088 = vmatpush3.bf16.msra.mxu1 %v2183_v15  ;;  %v2207_v37 = vld [vmem:[#allocation4 + $0xa8] ss:$28 sps:$4 sm:$0xff]   ;;  %v2213_v41 = vld [vmem:[#allocation4 + $0xe0] ss:$28 sps:$4 sm:$0xff]   ;;  %v2204_v43 = vld [vmem:[#allocation4 + $0x78] ss:$28 sps:$4 sm:$0xff]  }
  0x34   :  { %2089 = vmatprep.subr.bf16.mxu1 %v2540_v1  ;;  %v2215_v38 = vld [vmem:[#allocation4 + $0xe4] ss:$28 sps:$4 sm:$0xff]   ;;  %v2221_v42 = vld [vmem:[#allocation4 + $0x11c] ss:$28 sps:$4 sm:$0xff]   ;;  %v2212_v44 = vld [vmem:[#allocation4 + $0xb4] ss:$28 sps:$4 sm:$0xff]  }
  0x35   :  { %241 = vmatpush1.bf16.msra.mxu0 %v2167_v9  ;;  %v2219_v45 = vld [vmem:[#allocation4 + $0x118] ss:$28 sps:$4 sm:$0xff]   ;;  %v2210_v47 = vld [vmem:[#allocation4 + $0xb0] ss:$28 sps:$4 sm:$0xff]   ;;  %v2216_v50 = vld [vmem:[#allocation4 + $0xe8] ss:$28 sps:$4 sm:$0xff]  }
  0x36   :  { %242 = vmatprep.subr.bf16.mxu0 %v2168_v10  ;;  %v2227_v46 = vld [vmem:[#allocation4 + $0x154] ss:$28 sps:$4 sm:$0xff]   ;;  %v2218_v48 = vld [vmem:[#allocation4 + $0xec] ss:$28 sps:$4 sm:$0xff]   ;;  %v2224_v52 = vld [vmem:[#allocation4 + $0x124] ss:$28 sps:$4 sm:$0xff]  }
  0x37   :  { %2090 = vmatpush3.bf16.msra.mxu1 %v2184_v18  ;;  %v2225_v49 = vld [vmem:[#allocation4 + $0x150] ss:$28 sps:$4 sm:$0xff]   ;;  %v2231_v53 = vld [vmem:[#allocation4 + $0x188] ss:$28 sps:$4 sm:$0xff]   ;;  %v2222_v55 = vld [vmem:[#allocation4 + $0x120] ss:$28 sps:$4 sm:$0xff]  }
  0x38   :  { %2091 = vmatprep.subr.bf16.mxu1 %v2540_v1  ;;  %v2233_v51 = vld [vmem:[#allocation4 + $0x18c] ss:$28 sps:$4 sm:$0xff]   ;;  %v2239_v54 = vld [vmem:[#allocation4 + $0x1c4] ss:$28 sps:$4 sm:$0xff]   ;;  %v2230_v56 = vld [vmem:[#allocation4 + $0x15c] ss:$28 sps:$4 sm:$0xff]  }
  0x39   :  { %243 = vmatpush1.bf16.msra.mxu0 %v2170_v13  ;;  %v2237_v57 = vld [vmem:[#allocation4 + $0x1c0] ss:$28 sps:$4 sm:$0xff]   ;;  %v2228_v59 = vld [vmem:[#allocation4 + $0x158] ss:$28 sps:$4 sm:$0xff]   ;;  %v2234_v63 = vld [vmem:[#allocation4 + $0x190] ss:$28 sps:$4 sm:$0xff]  }
  0x3a   :  { %244 = vmatprep.subr.bf16.mxu0 %v2171_v14  ;;  %v2245_v58 = vld [vmem:[#allocation4 + $0x1fc] ss:$28 sps:$4 sm:$0xff]   ;;  %v2236_v60 = vld [vmem:[#allocation4 + $0x194] ss:$28 sps:$4 sm:$0xff]   ;;  %v2242_v2 = vld [vmem:[#allocation4 + $0x1cc] ss:$28 sps:$4 sm:$0xff]  }
  0x3b   :  { %2092 = vmatpush3.bf16.msra.mxu1 %v2185_v21  ;;  %v2243_v61 = vld [vmem:[#allocation4 + $0x1f8] ss:$28 sps:$4 sm:$0xff]   ;;  %v2249_v3 = vld [vmem:[#allocation4 + $0x230] ss:$28 sps:$4 sm:$0xff]   ;;  %v2240_v5 = vld [vmem:[#allocation4 + $0x1c8] ss:$28 sps:$4 sm:$0xff]  }
  0x3c   :  { %2093 = vmatprep.subr.bf16.mxu1 %v2540_v1  ;;  %v2251_v62 = vld [vmem:[#allocation4 + $0x234] ss:$28 sps:$4 sm:$0xff]   ;;  %v2257_v4 = vld [vmem:[#allocation4 + $0x26c] ss:$28 sps:$4 sm:$0xff]   ;;  %v2248_v6 = vld [vmem:[#allocation4 + $0x204] ss:$28 sps:$4 sm:$0xff]  }
  0x3d   :  { %245 = vmatpush1.bf16.msra.mxu0 %v2173_v16  ;;  %v2255_v7 = vld [vmem:[#allocation4 + $0x268] ss:$28 sps:$4 sm:$0xff]   ;;  %v2246_v9 = vld [vmem:[#allocation4 + $0x200] ss:$28 sps:$4 sm:$0xff]   ;;  %v2252_v13 = vld [vmem:[#allocation4 + $0x238] ss:$28 sps:$4 sm:$0xff]  }
  0x3e   :  { %246 = vmatprep.subr.bf16.mxu0 %v2174_v17  ;;  %v2263_v8 = vld [vmem:[#allocation4 + $0x2a4] ss:$28 sps:$4 sm:$0xff]   ;;  %v2254_v10 = vld [vmem:[#allocation4 + $0x23c] ss:$28 sps:$4 sm:$0xff]   ;;  %v2260_v14 = vld [vmem:[#allocation4 + $0x274] ss:$28 sps:$4 sm:$0xff]  }
  0x3f   :  { %2094 = vmatpush3.bf16.msra.mxu1 %v2186_v25  ;;  %v2261_v11 = vld [vmem:[#allocation4 + $0x2a0] ss:$28 sps:$4 sm:$0xff]   ;;  %v2267_v15 = vld [vmem:[#allocation4 + $0x2d8] ss:$28 sps:$4 sm:$0xff]   ;;  %v2258_v16 = vld [vmem:[#allocation4 + $0x270] ss:$28 sps:$4 sm:$0xff]  }
  0x40   :  { %2095 = vmatprep.subr.bf16.mxu1 %v2540_v1  ;;  %v2269_v12 = vld [vmem:[#allocation4 + $0x2dc] ss:$28 sps:$4 sm:$0xff]   ;;  %v2266_v17 = vld [vmem:[#allocation4 + $0x2ac] ss:$28 sps:$4 sm:$0xff]   ;;  %v2275_v21 = vld [vmem:[#allocation4 + $0x314] ss:$28 sps:$4 sm:$0xff]  }
  0x41   :  { %247 = vmatpush1.bf16.msra.mxu0 %v2176_v19  ;;  %v2264_v18 = vld [vmem:[#allocation4 + $0x2a8] ss:$28 sps:$4 sm:$0xff]  }
  0x42   :  { %248 = vmatprep.subr.bf16.mxu0 %v2177_v20  ;;  %v2272_v19 = vld [vmem:[#allocation4 + $0x2e4] ss:$28 sps:$4 sm:$0xff]   ;;  %v2281_v25 = vld [vmem:[#allocation4 + $0x34c] ss:$28 sps:$4 sm:$0xff]  }
  0x43   :  { %2096 = vmatpush3.bf16.msra.mxu1 %v2187_v28  ;;  %v2270_v20 = vld [vmem:[#allocation4 + $0x2e0] ss:$28 sps:$4 sm:$0xff]   ;;  %v2282_v28 = vld [vmem:[#allocation4 + $0x350] ss:$28 sps:$4 sm:$0xff]  }
  0x44   :  { %2097 = vmatprep.subr.bf16.mxu1 %v2540_v1 }
  0x45   :  { %249 = vmatpush1.bf16.msra.mxu0 %v2179_v22  ;;  %v2278_v22 = vld [vmem:[#allocation4 + $0x31c] ss:$28 sps:$4 sm:$0xff]  }
  0x46   :  { %1420 = vmatprep.subr.bf16.mxu0 %v2191_v23  ;;  %v2273_v23 = vld [vmem:[#allocation4 + $0x310] ss:$28 sps:$4 sm:$0xff]  }
  0x47   :  { %2098 = vmatpush3.bf16.msra.mxu1 %v2188_v31  ;;  %v85_v31 = vlaneseq }
  0x48   :  { %267 = vmatmul.mubr.bf16.vlgmr.msra.gmra.mrb[0].mxu0 %v2180_v24  ;;  %1506 = vmatprep.subr.bf16.mxu1 %v2194_v32 }
  0x49   :  { %1421 = vmatpush1.bf16.msra.mxu0 %v2189_v26  ;;  %v2284_v26 = vld [vmem:[#allocation4 + $0x354] ss:$28 sps:$4 sm:$0xff]   ;;  %v2610_v32 = vshrl.u32 %v85_v31, 7 }
  0x4a   :  { %1422 = vmatprep.subr.bf16.mxu0 %v2197_v27  ;;  %2100 = vmatmul.mubr.bf16.vlgmr.msra.gmra.mrb[0].mxu1 %v2180_v24  ;;  %v2276_v24 = vld [vmem:[#allocation4 + $0x318] ss:$28 sps:$4 sm:$0xff]   ;;  %v2279_v27 = vld [vmem:[#allocation4 + $0x348] ss:$28 sps:$4 sm:$0xff]  }
  0x4b   :  { %1507 = vmatpush1.bf16.msra.mxu1 %v2192_v35  ;;  %v91_v35 = vsub.s32 1, %v2610_v32  ;;  %v2335_v31 = vld [vmem:[#allocation4 + $0x14] ss:$28 sps:$4 sm:$0xff]  }
  0x4c   :  { %1508 = vmatprep.subr.bf16.mxu1 %v2200_v36 }
  0x4d   :  { %1423 = vmatpush1.bf16.msra.mxu0 %v2195_v29  ;;  %v2287_v29 = vld [vmem:[#allocation4 + $0x384] ss:$28 sps:$4 sm:$0xff]  }
  0x4e   :  { %1424 = vmatprep.subr.bf16.mxu0 %v2203_v30  ;;  %v2290_v30 = vld [vmem:[#allocation4 + $0x38c] ss:$28 sps:$4 sm:$0xff]  }
  0x4f   :  { %1509 = vmatpush1.bf16.msra.mxu1 %v2198_v39 }
  0x50   :  { %1510 = vmatprep.subr.bf16.mxu1 %v2206_v40 }
  0x51   :  { %1425 = vmatpush1.bf16.msra.mxu0 %v2201_v33  ;;  %v87_v33 = vsub.s32 0, %v2610_v32 }
  0x52   :  { %1426 = vmatprep.subr.bf16.mxu0 %v2209_v34  ;;  %v83_v34 = vld [vmem:[%s2721_s2] sm:$0x7] }
  0x53   :  { %1511 = vmatpush1.bf16.msra.mxu1 %v2204_v43  ;;  %v88_v36 = vrot.slane %v83_v34, %v87_v33 }
  0x54   :  { %1512 = vmatprep.subr.bf16.mxu1 %v2212_v44 }
  0x55   :  { %1427 = vmatpush1.bf16.msra.mxu0 %v2207_v37  ;;  %v92_v37 = vrot.slane %v83_v34, %v91_v35 }
  0x56   :  { %1428 = vmatprep.subr.bf16.mxu0 %v2215_v38 }
  0x57   :  { %1513 = vmatpush1.bf16.msra.mxu1 %v2210_v47 }
  0x58   :  { %1514 = vmatprep.subr.bf16.mxu1 %v2218_v48 }
  0x59   :  { %1429 = vmatpush1.bf16.msra.mxu0 %v2213_v41 }
  0x5a   :  { %1430 = vmatprep.subr.bf16.mxu0 %v2221_v42 }
  0x5b   :  { %1515 = vmatpush1.bf16.msra.mxu1 %v2216_v50 }
  0x5c   :  { %1516 = vmatprep.subr.bf16.mxu1 %v2224_v52 }
  0x5d   :  { %1431 = vmatpush1.bf16.msra.mxu0 %v2219_v45 }
  0x5e   :  { %1432 = vmatprep.subr.bf16.mxu0 %v2227_v46  ;;  %v95_v46 = vsub.s32 2, %v2610_v32 }
  0x5f   :  { %1517 = vmatpush1.bf16.msra.mxu1 %v2222_v55 }
  0x60   :  { %1518 = vmatprep.subr.bf16.mxu1 %v2230_v56  ;;  %v96_v55 = vrot.slane %v83_v34, %v95_v46  ;;  %v2293_v56 = vld [vmem:[#allocation4 + $0x3bc] ss:$28 sps:$4 sm:$0xff]  }
  0x61   :  { %1433 = vmatpush1.bf16.msra.mxu0 %v2225_v49  ;;  %v2336_v34 = vld [vmem:[#allocation4 + $0x1d8] ss:$28 sps:$4 sm:$0xff]  }
  0x62   :  { %1434 = vmatprep.subr.bf16.mxu0 %v2233_v51 }
  0x63   :  { %1519 = vmatpush1.bf16.msra.mxu1 %v2228_v59  ;;  %v2291_v59 = vld [vmem:[#allocation4 + $0x3b8] ss:$28 sps:$4 sm:$0xff]  }
  0x64   :  { %1520 = vmatprep.subr.bf16.mxu1 %v2236_v60  ;;  %v2294_v60 = vld [vmem:[#allocation4 + $0x3c0] ss:$28 sps:$4 sm:$0xff]  }
  0x65   :  { %1435 = vmatpush1.bf16.msra.mxu0 %v2231_v53  ;;  %v2285_v53 = vld [vmem:[#allocation4 + $0x380] ss:$28 sps:$4 sm:$0xff]  }
  0x66   :  { %1436 = vmatprep.subr.bf16.mxu0 %v2239_v54  ;;  %v2288_v54 = vld [vmem:[#allocation4 + $0x388] ss:$28 sps:$4 sm:$0xff]  }
  0x67   :  { %1521 = vmatpush1.bf16.msra.mxu1 %v2234_v63  ;;  %v2299_v63 = vld [vmem:[#allocation4 + $0x3f4] ss:$28 sps:$4 sm:$0xff]  }
  0x68   :  { %1522 = vmatprep.subr.bf16.mxu1 %v2242_v2  ;;  %v2302_v2 = vld [vmem:[#allocation4 + $0x3fc] ss:$28 sps:$4 sm:$0xff]  }
  0x69   :  { %1437 = vmatpush1.bf16.msra.mxu0 %v2237_v57  ;;  %v2296_v57 = vld [vmem:[#allocation4 + $0x3c4] ss:$28 sps:$4 sm:$0xff]  }
  0x6a   :  { %1438 = vmatprep.subr.bf16.mxu0 %v2245_v58 }
  0x6b   :  { %1523 = vmatpush1.bf16.msra.mxu1 %v2240_v5 }
  0x6c   :  { %1524 = vmatprep.subr.bf16.mxu1 %v2248_v6 }
  0x6d   :  { %1439 = vmatpush1.bf16.msra.mxu0 %v2243_v61 }
  0x6e   :  { %1440 = vmatprep.subr.bf16.mxu0 %v2251_v62 }
  0x6f   :  { %1525 = vmatpush1.bf16.msra.mxu1 %v2246_v9 }
  0x70   :  { %1526 = vmatprep.subr.bf16.mxu1 %v2254_v10  ;;  %v2305_v10 = vld [vmem:[#allocation4 + $0x42c] ss:$28 sps:$4 sm:$0xff]  }
  0x71   :  { %1441 = vmatpush1.bf16.msra.mxu0 %v2249_v3 }
  0x72   :  { %1442 = vmatprep.subr.bf16.mxu0 %v2257_v4 }
  0x73   :  { %1527 = vmatpush1.bf16.msra.mxu1 %v2252_v13  ;;  %v2303_v13 = vld [vmem:[#allocation4 + $0x428] ss:$28 sps:$4 sm:$0xff]  }
  0x74   :  { %1528 = vmatprep.subr.bf16.mxu1 %v2260_v14  ;;  %v2306_v14 = vld [vmem:[#allocation4 + $0x430] ss:$28 sps:$4 sm:$0xff]  }
  0x75   :  { %1443 = vmatpush1.bf16.msra.mxu0 %v2255_v7  ;;  %v2297_v7 = vld [vmem:[#allocation4 + $0x3f0] ss:$28 sps:$4 sm:$0xff]  }
  0x76   :  { %1444 = vmatprep.subr.bf16.mxu0 %v2263_v8  ;;  %v2300_v8 = vld [vmem:[#allocation4 + $0x3f8] ss:$28 sps:$4 sm:$0xff]  }
  0x77   :  { %1529 = vmatpush1.bf16.msra.mxu1 %v2258_v16  ;;  %v2314_v16 = vld [vmem:[#allocation4 + $0x46c] ss:$28 sps:$4 sm:$0xff]  }
  0x78   :  { %1530 = vmatprep.subr.bf16.mxu1 %v2266_v17  ;;  %v2309_v17 = vld [vmem:[#allocation4 + $0x460] ss:$28 sps:$4 sm:$0xff]  }
  0x79   :  { %1445 = vmatpush1.bf16.msra.mxu0 %v2261_v11  ;;  %v2308_v11 = vld [vmem:[#allocation4 + $0x434] ss:$28 sps:$4 sm:$0xff]  }
  0x7a   :  { %1446 = vmatprep.subr.bf16.mxu0 %v2269_v12 }
  0x7b   :  { %1531 = vmatpush1.bf16.msra.mxu1 %v2264_v18  ;;  %v2312_v18 = vld [vmem:[#allocation4 + $0x468] ss:$28 sps:$4 sm:$0xff]  }
  0x7c   :  { %1532 = vmatprep.subr.bf16.mxu1 %v2272_v19  ;;  %v2317_v19 = vld [vmem:[#allocation4 + $0x49c] ss:$28 sps:$4 sm:$0xff]  }
  0x7d   :  { %1447 = vmatpush1.bf16.msra.mxu0 %v2267_v15  ;;  %v2311_v15 = vld [vmem:[#allocation4 + $0x464] ss:$28 sps:$4 sm:$0xff]  }
  0x7e   :  { %1448 = vmatprep.subr.bf16.mxu0 %v2275_v21  ;;  %v2315_v21 = vld [vmem:[#allocation4 + $0x498] ss:$28 sps:$4 sm:$0xff]  }
  0x7f   :  { %1533 = vmatpush1.bf16.msra.mxu1 %v2270_v20  ;;  %v2320_v20 = vld [vmem:[#allocation4 + $0x4a4] ss:$28 sps:$4 sm:$0xff]  }
  0x80   :  { %1534 = vmatprep.subr.bf16.mxu1 %v2278_v22  ;;  %v2318_v22 = vld [vmem:[#allocation4 + $0x4a0] ss:$28 sps:$4 sm:$0xff]  }
  0x81   :  { %1449 = vmatpush1.bf16.msra.mxu0 %v2273_v23  ;;  %v2323_v23 = vld [vmem:[#allocation4 + $0x4d4] ss:$28 sps:$4 sm:$0xff]  }
  0x82   :  { %1450 = vmatprep.subr.bf16.mxu0 %v2281_v25  ;;  %v2321_v25 = vld [vmem:[#allocation4 + $0x4d0] ss:$28 sps:$4 sm:$0xff]  }
  0x83   :  { %1535 = vmatpush1.bf16.msra.mxu1 %v2276_v24  ;;  %v2326_v24 = vld [vmem:[#allocation4 + $0x4dc] ss:$28 sps:$4 sm:$0xff]  }
  0x84   :  { %1536 = vmatprep.subr.bf16.mxu1 %v2284_v26  ;;  %v2324_v26 = vld [vmem:[#allocation4 + $0x4d8] ss:$28 sps:$4 sm:$0xff]  }
  0x85   :  { %1451 = vmatpush1.bf16.msra.mxu0 %v2279_v27  ;;  %v2329_v27 = vld [vmem:[#allocation4 + $0x50c] ss:$28 sps:$4 sm:$0xff]  }
  0x86   :  { %1463 = vmatprep.subr.bf16.mxu0 %v2287_v29  ;;  %v2327_v29 = vld [vmem:[#allocation4 + $0x508] ss:$28 sps:$4 sm:$0xff]  }
  0x87   :  { %1537 = vmatpush1.bf16.msra.mxu1 %v2282_v28  ;;  %v2332_v28 = vld [vmem:[#allocation4 + $0x514] ss:$28 sps:$4 sm:$0xff]  }
  0x88   :  { %1549 = vmatprep.subr.bf16.mxu1 %v2290_v30  ;;  %v2330_v30 = vld [vmem:[#allocation4 + $0x510] ss:$28 sps:$4 sm:$0xff]  }
 0x11b   :  { %v268_v38 = vpop.f32.mrb[0].mxu0 }
 0x11c   :  { %v269_v39 = vadd.f32 %v268_v38, %v88_v36  ;;  %v270_v40 = vpop.f32.mrb[1].mxu0  ;;  %v2340_v38 = vld [vmem:[#allocation4 + $0x4c] ss:$28 sps:$4 sm:$0xff]  }
 0x11d   :  { %v271_v41 = vadd.f32 %v270_v40, %v92_v37  ;;  %v272_v42 = vpop.f32.mrb[2].mxu0  ;;  %v311_v58 = vpop.f32.mrb[0].mxu1  ;;  %v2338_v40 = vld [vmem:[#allocation4 + $0x48] ss:$28 sps:$4 sm:$0xff]  }
 0x11e   :  { %v273_v43 = vadd.f32 %v272_v42, %v88_v36  ;;  %v274_v44 = vpop.f32.mrb[3].mxu0  ;;  %v318_v47 = vmax.f32 %v269_v39, 0.0  ;;  %v312_v61 = vadd.f32 %v311_v58, %v96_v55  ;;  %v2101_v62 = vpop.f32.mrb[1].mxu1  ;;  %v2333_v36 = vld [vmem:[#allocation4 + $0x10] ss:$28 sps:$4 sm:$0xff]  }
 0x11f   :  { %v275_v45 = vadd.f32 %v274_v44, %v92_v37  ;;  %v319_v49 = vmax.f32 %v271_v41, 0.0  ;;  %v314_v3 = vpop.f32.mrb[2].mxu1  ;;  %v2337_v37 = vld [vmem:[#allocation4 + $0x18] ss:$28 sps:$4 sm:$0xff]   ;;  %v2341_v39 = vld [vmem:[#allocation4 + $0x210] ss:$28 sps:$4 sm:$0xff]  }
 0x120   :  { %v321_v48 = vmax.f32 %v273_v43, 0.0  ;;  %v320_v4 = vmax.f32 %v312_v61, 0.0  ;;  %v315_v5 = vadd.f32 %v314_v3, %v96_v55  ;;  %v2102_v6 = vpop.f32.mrb[3].mxu1  ;;  %v2342_v41 = vld [vmem:[#allocation4 + $0x50] ss:$28 sps:$4 sm:$0xff]  }
 0x121   :  { %v322_v50 = vmax.f32 %v275_v45, 0.0  ;;  %v2345_v42 = vld [vmem:[#allocation4 + $0x84] ss:$28 sps:$4 sm:$0xff]   ;;  %v2357_v55 = vld [vmem:[#allocation4 + $0xf8] ss:$28 sps:$4 sm:$0xff]  }
 0x122   :  { %v2622_v51 = vpack.c.bf16 %v321_v48, %v318_v47  ;;  %v323_v9 = vmax.f32 %v315_v5, 0.0  ;;  %v2346_v43 = vld [vmem:[#allocation4 + $0x248] ss:$28 sps:$4 sm:$0xff]   ;;  %v2343_v44 = vld [vmem:[#allocation4 + $0x80] ss:$28 sps:$4 sm:$0xff]  }
 0x123   :  { %v2624_v52 = vpack.c.bf16 %v322_v50, %v319_v49  ;;  %v2347_v45 = vld [vmem:[#allocation4 + $0x88] ss:$28 sps:$4 sm:$0xff]   ;;  %v2350_v47 = vld [vmem:[#allocation4 + $0xbc] ss:$28 sps:$4 sm:$0xff]   ;;  %v2375_v6 = vld [vmem:[#allocation4 + $0x1d4] ss:$28 sps:$4 sm:$0xff]  }
 0x124   :  { %v2634_v12 = vpack.c.bf16 %v323_v9, %v320_v4  ;;  %v2351_v48 = vld [vmem:[#allocation4 + $0x280] ss:$28 sps:$4 sm:$0xff]   ;;  %v2348_v49 = vld [vmem:[#allocation4 + $0xb8] ss:$28 sps:$4 sm:$0xff]   ;;  %v2358_v58 = vld [vmem:[#allocation4 + $0x128] ss:$28 sps:$4 sm:$0xff]  }
 0x125   :  { %1452 = vmatprep.mubr.bf16.mxu0 %v2624_v52  ;;  %1538 = vmatprep.mubr.bf16.mxu1 %v2624_v52  ;;  %v2352_v50 = vld [vmem:[#allocation4 + $0xc0] ss:$28 sps:$4 sm:$0xff]   ;;  %v2366_v61 = vld [vmem:[#allocation4 + $0x328] ss:$28 sps:$4 sm:$0xff]   ;;  %v2368_v4 = vld [vmem:[#allocation4 + $0x198] ss:$28 sps:$4 sm:$0xff]  }
 0x126   :  { %1453 = vmatmul.mubr.bf16.vlgmr.msra.gmra.mrb[4].mxu0 %v2622_v51  ;;  %1539 = vmatmul.mubr.bf16.vlgmr.msra.gmra.mrb[4].mxu1 %v2622_v51  ;;  %v2363_v62 = vld [vmem:[#allocation4 + $0x160] ss:$28 sps:$4 sm:$0xff]   ;;  %v2379_v9 = vld [vmem:[#allocation4 + $0x20c] ss:$28 sps:$4 sm:$0xff]  }
 0x127   :  { %1464 = vmatpush1.bf16.msra.mxu0 %v2285_v53  ;;  %1550 = vmatpush1.bf16.msra.mxu1 %v2288_v54  ;;  %v2355_v53 = vld [vmem:[#allocation4 + $0xf4] ss:$28 sps:$4 sm:$0xff]   ;;  %v2371_v3 = vld [vmem:[#allocation4 + $0x360] ss:$28 sps:$4 sm:$0xff]  }
 0x128   :  { %1465 = vmatprep.subr.bf16.mxu0 %v2293_v56  ;;  %1551 = vmatprep.subr.bf16.mxu1 %v2296_v57  ;;  %v2353_v54 = vld [vmem:[#allocation4 + $0xf0] ss:$28 sps:$4 sm:$0xff]   ;;  %v2372_v5 = vld [vmem:[#allocation4 + $0x1a0] ss:$28 sps:$4 sm:$0xff]  }
 0x129   :  { %1495 = vmatprep.mubr.bf16.mxu0 %v2539_v0  ;;  %1581 = vmatprep.mubr.bf16.mxu1 %v2539_v0  ;;  %v2360_v56 = vld [vmem:[#allocation4 + $0x12c] ss:$28 sps:$4 sm:$0xff]  }
 0x12a   :  { %v2361_v57 = vld [vmem:[#allocation4 + $0x2f0] ss:$28 sps:$4 sm:$0xff]  }
 0x12b   :  { %1466 = vmatpush1.bf16.msra.mxu0 %v2291_v59  ;;  %1552 = vmatpush1.bf16.msra.mxu1 %v2294_v60  ;;  %v2362_v59 = vld [vmem:[#allocation4 + $0x130] ss:$28 sps:$4 sm:$0xff]   ;;  %v2365_v60 = vld [vmem:[#allocation4 + $0x164] ss:$28 sps:$4 sm:$0xff]  }
 0x12c   :  { %1467 = vmatprep.subr.bf16.mxu0 %v2299_v63  ;;  %1553 = vmatprep.subr.bf16.mxu1 %v2302_v2  ;;  %v2367_v63 = vld [vmem:[#allocation4 + $0x168] ss:$28 sps:$4 sm:$0xff]   ;;  %v2370_v2 = vld [vmem:[#allocation4 + $0x19c] ss:$28 sps:$4 sm:$0xff]  }
 0x12f   :  { %1468 = vmatpush1.bf16.msra.mxu0 %v2297_v7  ;;  %1554 = vmatpush1.bf16.msra.mxu1 %v2300_v8  ;;  %v2373_v7 = vld [vmem:[#allocation4 + $0x1d0] ss:$28 sps:$4 sm:$0xff]   ;;  %v2376_v8 = vld [vmem:[#allocation4 + $0x398] ss:$28 sps:$4 sm:$0xff]  }
 0x130   :  { %1469 = vmatprep.subr.bf16.mxu0 %v2305_v10  ;;  %1555 = vmatprep.subr.bf16.mxu1 %v2308_v11  ;;  %v2377_v10 = vld [vmem:[#allocation4 + $0x208] ss:$28 sps:$4 sm:$0xff]   ;;  %v2380_v11 = vld [vmem:[#allocation4 + $0x3d0] ss:$28 sps:$4 sm:$0xff]  }
 0x133   :  { %1470 = vmatpush1.bf16.msra.mxu0 %v2303_v13  ;;  %1556 = vmatpush1.bf16.msra.mxu1 %v2306_v14  ;;  %v2383_v13 = vld [vmem:[#allocation4 + $0x244] ss:$28 sps:$4 sm:$0xff]  }
 0x134   :  { %1471 = vmatprep.subr.bf16.mxu0 %v2311_v15  ;;  %1557 = vmatprep.subr.bf16.mxu1 %v2314_v16  ;;  %v2381_v14 = vld [vmem:[#allocation4 + $0x240] ss:$28 sps:$4 sm:$0xff]   ;;  %v2384_v15 = vld [vmem:[#allocation4 + $0x408] ss:$28 sps:$4 sm:$0xff]  }
 0x135   :  { %v2387_v16 = vld [vmem:[#allocation4 + $0x27c] ss:$28 sps:$4 sm:$0xff]  }
 0x137   :  { %1472 = vmatpush1.bf16.msra.mxu0 %v2309_v17  ;;  %1558 = vmatpush1.bf16.msra.mxu1 %v2312_v18  ;;  %v2385_v17 = vld [vmem:[#allocation4 + $0x278] ss:$28 sps:$4 sm:$0xff]   ;;  %v2388_v18 = vld [vmem:[#allocation4 + $0x440] ss:$28 sps:$4 sm:$0xff]  }
 0x138   :  { %1473 = vmatprep.subr.bf16.mxu0 %v2317_v19  ;;  %1559 = vmatprep.subr.bf16.mxu1 %v2320_v20  ;;  %v2391_v19 = vld [vmem:[#allocation4 + $0x2b4] ss:$28 sps:$4 sm:$0xff]  }
 0x139   :  { %v2389_v20 = vld [vmem:[#allocation4 + $0x2b0] ss:$28 sps:$4 sm:$0xff]  }
 0x13b   :  { %1474 = vmatpush1.bf16.msra.mxu0 %v2315_v21  ;;  %1560 = vmatpush1.bf16.msra.mxu1 %v2318_v22  ;;  %v2392_v21 = vld [vmem:[#allocation4 + $0x478] ss:$28 sps:$4 sm:$0xff]   ;;  %v2395_v22 = vld [vmem:[#allocation4 + $0x2ec] ss:$28 sps:$4 sm:$0xff]  }
 0x13c   :  { %1475 = vmatprep.subr.bf16.mxu0 %v2323_v23  ;;  %1561 = vmatprep.subr.bf16.mxu1 %v2326_v24  ;;  %v2393_v23 = vld [vmem:[#allocation4 + $0x2e8] ss:$28 sps:$4 sm:$0xff]   ;;  %v2396_v24 = vld [vmem:[#allocation4 + $0x4b0] ss:$28 sps:$4 sm:$0xff]  }
 0x13f   :  { %1476 = vmatpush1.bf16.msra.mxu0 %v2321_v25  ;;  %1562 = vmatpush1.bf16.msra.mxu1 %v2324_v26  ;;  %v2399_v25 = vld [vmem:[#allocation4 + $0x324] ss:$28 sps:$4 sm:$0xff]  }
 0x140   :  { %1477 = vmatprep.subr.bf16.mxu0 %v2329_v27  ;;  %1563 = vmatprep.subr.bf16.mxu1 %v2332_v28  ;;  %v2397_v26 = vld [vmem:[#allocation4 + $0x320] ss:$28 sps:$4 sm:$0xff]   ;;  %v2400_v27 = vld [vmem:[#allocation4 + $0x4e8] ss:$28 sps:$4 sm:$0xff]  }
 0x141   :  { %v2403_v28 = vld [vmem:[#allocation4 + $0x35c] ss:$28 sps:$4 sm:$0xff]  }
 0x143   :  { %1478 = vmatpush1.bf16.msra.mxu0 %v2327_v29  ;;  %1564 = vmatpush1.bf16.msra.mxu1 %v2330_v30  ;;  %v2401_v29 = vld [vmem:[#allocation4 + $0x358] ss:$28 sps:$4 sm:$0xff]   ;;  %v2404_v30 = vld [vmem:[#allocation4 + $0x520] ss:$28 sps:$4 sm:$0xff]  }
 0x144   :  { %1592 = vmatprep.subr.bf16.mxu0 %v2335_v31  ;;  %2052 = vmatprep.subr.bf16.mxu1 %v2336_v34  ;;  %v2407_v31 = vld [vmem:[#allocation4 + $0x394] ss:$28 sps:$4 sm:$0xff]  }
 0x145   :  { %v2405_v34 = vld [vmem:[#allocation4 + $0x390] ss:$28 sps:$4 sm:$0xff]  }
 0x146   :  { %1496 = vmatmul.mubr.bf16.vlgmr.msra.gmra.mrb[4].mxu0 %v2634_v12  ;;  %1582 = vmatmul.mubr.bf16.vlgmr.msra.gmra.mrb[4].mxu1 %v2634_v12 }
 0x147   :  { %1593 = vmatpush1.bf16.msra.mxu0 %v2333_v36  ;;  %1624 = vmatprep.mubr.bf16.mxu0 %v2624_v52  ;;  %v2410_v36 = vld [vmem:[#allocation4 + $0x3cc] ss:$28 sps:$4 sm:$0xff]  }
 0x148   :  { %2053 = vmatpush3.bf16.msra.mxu1 %v2337_v37  ;;  %1710 = vmatprep.mubr.bf16.mxu1 %v2624_v52  ;;  %v2356_v52 = vld [vmem:[#allocation4 + $0x2b8] ss:$28 sps:$4 sm:$0xff]   ;;  %v2408_v37 = vld [vmem:[#allocation4 + $0x3c8] ss:$28 sps:$4 sm:$0xff]  }
 0x149   :  { %1594 = vmatprep.subr.bf16.mxu0 %v2340_v38  ;;  %2054 = vmatprep.subr.bf16.mxu1 %v2341_v39  ;;  %v2413_v38 = vld [vmem:[#allocation4 + $0x404] ss:$28 sps:$4 sm:$0xff]  }
 0x14a   :  { %v2411_v39 = vld [vmem:[#allocation4 + $0x400] ss:$28 sps:$4 sm:$0xff]  }
 0x14b   :  { %1595 = vmatpush1.bf16.msra.mxu0 %v2338_v40  ;;  %v2416_v40 = vld [vmem:[#allocation4 + $0x43c] ss:$28 sps:$4 sm:$0xff]  }
 0x14c   :  { %2055 = vmatpush3.bf16.msra.mxu1 %v2342_v41  ;;  %1596 = vmatprep.subr.bf16.mxu0 %v2345_v42  ;;  %v2419_v41 = vld [vmem:[#allocation4 + $0x474] ss:$28 sps:$4 sm:$0xff]  }
 0x14d   :  { %2056 = vmatprep.subr.bf16.mxu1 %v2346_v43  ;;  %v2417_v42 = vld [vmem:[#allocation4 + $0x470] ss:$28 sps:$4 sm:$0xff]   ;;  %v2420_v43 = vld [vmem:[#allocation4 + $0x4a8] ss:$28 sps:$4 sm:$0xff]  }
 0x14f   :  { %1597 = vmatpush1.bf16.msra.mxu0 %v2343_v44  ;;  %v2425_v44 = vld [vmem:[#allocation4 + $0x4e4] ss:$28 sps:$4 sm:$0xff]  }
 0x150   :  { %2057 = vmatpush3.bf16.msra.mxu1 %v2347_v45  ;;  %1598 = vmatprep.subr.bf16.mxu0 %v2350_v47  ;;  %v2423_v45 = vld [vmem:[#allocation4 + $0x4e0] ss:$28 sps:$4 sm:$0xff]   ;;  %v2426_v47 = vld [vmem:[#allocation4 + $0x518] ss:$28 sps:$4 sm:$0xff]  }
 0x151   :  { %2058 = vmatprep.subr.bf16.mxu1 %v2351_v48  ;;  %v2658_v48 = vld [vmem:[%s2723_s4] sm:$0xff] }
 0x153   :  { %1599 = vmatpush1.bf16.msra.mxu0 %v2348_v49  ;;  %v535_v49 = vsub.s32 3, %v2610_v32 }
 0x154   :  { %2059 = vmatpush3.bf16.msra.mxu1 %v2352_v50  ;;  %1600 = vmatprep.subr.bf16.mxu0 %v2355_v53  ;;  %v524_v50 = vrot.slane %v2658_v48, %v87_v33  ;;  %v532_v53 = vrot.slane %v2658_v48, %v95_v46 }
 0x155   :  { %2060 = vmatprep.subr.bf16.mxu1 %v2356_v52  ;;  %v528_v52 = vrot.slane %v2658_v48, %v91_v35 }
 0x157   :  { %1601 = vmatpush1.bf16.msra.mxu0 %v2353_v54 }
 0x158   :  { %2061 = vmatpush3.bf16.msra.mxu1 %v2357_v55  ;;  %1602 = vmatprep.subr.bf16.mxu0 %v2360_v56 }
 0x159   :  { %2062 = vmatprep.subr.bf16.mxu1 %v2361_v57 }
 0x15b   :  { %1603 = vmatpush1.bf16.msra.mxu0 %v2358_v58 }
 0x15c   :  { %2063 = vmatpush3.bf16.msra.mxu1 %v2362_v59  ;;  %1604 = vmatprep.subr.bf16.mxu0 %v2365_v60 }
 0x15d   :  { %2064 = vmatprep.subr.bf16.mxu1 %v2366_v61 }
 0x15f   :  { %1605 = vmatpush1.bf16.msra.mxu0 %v2363_v62 }
 0x160   :  { %2065 = vmatpush3.bf16.msra.mxu1 %v2367_v63  ;;  %1606 = vmatprep.subr.bf16.mxu0 %v2370_v2 }
 0x161   :  { %2066 = vmatprep.subr.bf16.mxu1 %v2371_v3 }
 0x163   :  { %1607 = vmatpush1.bf16.msra.mxu0 %v2368_v4 }
 0x164   :  { %2067 = vmatpush3.bf16.msra.mxu1 %v2372_v5  ;;  %1608 = vmatprep.subr.bf16.mxu0 %v2375_v6 }
 0x165   :  { %2103 = vmatprep.subr.bf16.mxu1 %v2540_v1 }
 0x167   :  { %1711 = vmatmul.mubr.bf16.vlgmr.msra.gmra.mrb[8].mxu1 %v2622_v51  ;;  %1609 = vmatpush1.bf16.msra.mxu0 %v2373_v7 }
 0x168   :  { %2104 = vmatpush3.bf16.msra.mxu1 %v2376_v8  ;;  %1610 = vmatprep.subr.bf16.mxu0 %v2379_v9 }
 0x169   :  { %2105 = vmatprep.subr.bf16.mxu1 %v2540_v1  ;;  %2119 = vmatprep.mubr.msk.bf16.mxu1 %vm2541_vm0, %v2540_v1 }
 0x16b   :  { %1611 = vmatpush1.bf16.msra.mxu0 %v2377_v10 }
 0x16c   :  { %2106 = vmatpush3.bf16.msra.mxu1 %v2380_v11  ;;  %1612 = vmatprep.subr.bf16.mxu0 %v2383_v13 }
 0x16d   :  { %2107 = vmatprep.subr.bf16.mxu1 %v2540_v1 }
 0x16f   :  { %1613 = vmatpush1.bf16.msra.mxu0 %v2381_v14 }
 0x170   :  { %2108 = vmatpush3.bf16.msra.mxu1 %v2384_v15  ;;  %1614 = vmatprep.subr.bf16.mxu0 %v2387_v16 }
 0x171   :  { %2109 = vmatprep.subr.bf16.mxu1 %v2540_v1 }
 0x173   :  { %1615 = vmatpush1.bf16.msra.mxu0 %v2385_v17 }
 0x174   :  { %2110 = vmatpush3.bf16.msra.mxu1 %v2388_v18  ;;  %1616 = vmatprep.subr.bf16.mxu0 %v2391_v19 }
 0x175   :  { %2111 = vmatprep.subr.bf16.mxu1 %v2540_v1 }
 0x177   :  { %1617 = vmatpush1.bf16.msra.mxu0 %v2389_v20 }
 0x178   :  { %2112 = vmatpush3.bf16.msra.mxu1 %v2392_v21  ;;  %1618 = vmatprep.subr.bf16.mxu0 %v2395_v22 }
 0x179   :  { %2113 = vmatprep.subr.bf16.mxu1 %v2540_v1 }
 0x17b   :  { %1619 = vmatpush1.bf16.msra.mxu0 %v2393_v23 }
 0x17c   :  { %2114 = vmatpush3.bf16.msra.mxu1 %v2396_v24  ;;  %1620 = vmatprep.subr.bf16.mxu0 %v2399_v25 }
 0x17d   :  { %2115 = vmatprep.subr.bf16.mxu1 %v2540_v1 }
 0x17f   :  { %1621 = vmatpush1.bf16.msra.mxu0 %v2397_v26 }
 0x180   :  { %2116 = vmatpush3.bf16.msra.mxu1 %v2400_v27  ;;  %1622 = vmatprep.subr.bf16.mxu0 %v2403_v28 }
 0x181   :  { %2117 = vmatprep.subr.bf16.mxu1 %v2540_v1  ;;  %v2414_v1 = vld [vmem:[#allocation4 + $0x438] ss:$28 sps:$4 sm:$0xff]  }
 0x183   :  { %1623 = vmatpush1.bf16.msra.mxu0 %v2401_v29 }
 0x184   :  { %2118 = vmatpush3.bf16.msra.mxu1 %v2404_v30  ;;  %1635 = vmatprep.subr.bf16.mxu0 %v2407_v31 }
 0x186   :  { %1625 = vmatmul.mubr.bf16.vlgmr.msra.gmra.mrb[8].mxu0 %v2622_v51  ;;  %v2422_v51 = vld [vmem:[#allocation4 + $0x4ac] ss:$28 sps:$4 sm:$0xff]  }
 0x187   :  { %2120 = vmatmul.mubr.bf16.vlgmr.msra.gmra.mrb[12].mxu1 %v2634_v12  ;;  %1636 = vmatpush1.bf16.msra.mxu0 %v2405_v34 }
 0x188   :  { %1637 = vmatprep.subr.bf16.mxu0 %v2410_v36  ;;  %1667 = vmatprep.mubr.bf16.mxu0 %v2539_v0  ;;  %v2428_v0 = vld [vmem:[#allocation4 + $0x51c] ss:$28 sps:$4 sm:$0xff]  }
 0x18b   :  { %1638 = vmatpush1.bf16.msra.mxu0 %v2408_v37 }
 0x18c   :  { %1639 = vmatprep.subr.bf16.mxu0 %v2413_v38 }
 0x18f   :  { %1640 = vmatpush1.bf16.msra.mxu0 %v2411_v39 }
 0x190   :  { %1641 = vmatprep.subr.bf16.mxu0 %v2416_v40 }
 0x193   :  { %1642 = vmatpush1.bf16.msra.mxu0 %v2414_v1 }
 0x194   :  { %1643 = vmatprep.subr.bf16.mxu0 %v2419_v41 }
 0x197   :  { %1644 = vmatpush1.bf16.msra.mxu0 %v2417_v42 }
 0x198   :  { %1645 = vmatprep.subr.bf16.mxu0 %v2422_v51 }
 0x19b   :  { %1646 = vmatpush1.bf16.msra.mxu0 %v2420_v43 }
 0x19c   :  { %1647 = vmatprep.subr.bf16.mxu0 %v2425_v44 }
 0x19f   :  { %1648 = vmatpush1.bf16.msra.mxu0 %v2423_v45 }
 0x1a0   :  { %1649 = vmatprep.subr.bf16.mxu0 %v2428_v0 }
 0x1a3   :  { %1650 = vmatpush1.bf16.msra.mxu0 %v2426_v47 }
 0x1a6   :  { %1668 = vmatmul.mubr.bf16.vlgmr.msra.gmra.mrb[8].mxu0 %v2634_v12  ;;  %v536_v12 = vrot.slane %v2658_v48, %v535_v49 }
 0x219   :  { %v1497_v54 = vpop.f32.mrb[4].mxu0  ;;  %v1583_v55 = vpop.f32.mrb[4].mxu1 }
 0x21a   :  { %v2123_v56 = vadd.f32 %v1497_v54, %v524_v50  ;;  %v2127_v57 = vadd.f32 %v1583_v55, %v532_v53  ;;  %v1499_v58 = vpop.f32.mrb[5].mxu0  ;;  %v1585_v59 = vpop.f32.mrb[5].mxu1  ;;  %v547_v54 = vsub.s32 6, %v2610_v32 }
 0x21b   :  { %v2124_v60 = vadd.f32 %v1499_v58, %v528_v52  ;;  %v2128_v61 = vadd.f32 %v1585_v59, %v536_v12  ;;  %v1501_v62 = vpop.f32.mrb[6].mxu0  ;;  %v1587_v33 = vpop.f32.mrb[6].mxu1 }
 0x21c   :  { %v1760_v63 = vsub.f32 0.0, %v2123_v56  ;;  %v1762_v2 = vsub.f32 0.0, %v2127_v57  ;;  %v2125_v3 = vadd.f32 %v1501_v62, %v524_v50  ;;  %v2129_v46 = vadd.f32 %v1587_v33, %v532_v53  ;;  %v1503_v4 = vpop.f32.mrb[7].mxu0  ;;  %v1589_v5 = vpop.f32.mrb[7].mxu1 }
 0x21d   :  { %v1761_v6 = vsub.f32 0.0, %v2124_v60  ;;  %v1763_v35 = vsub.f32 0.0, %v2128_v61  ;;  %v2126_v7 = vadd.f32 %v1503_v4, %v528_v52  ;;  %v2130_v8 = vadd.f32 %v1589_v5, %v536_v12 }
 0x21e   :  { %v1774_v9 = vmul.f32 1.442695, %v1760_v63  ;;  %v1778_v10 = vmul.f32 1.442695, %v1762_v2  ;;  %v1767_v11 = vsub.f32 0.0, %v2125_v3  ;;  %v1769_v13 = vsub.f32 0.0, %v2129_v46 }
 0x21f   :  { %v1776_v14 = vmul.f32 1.442695, %v1761_v6  ;;  %v1780_v15 = vmul.f32 1.442695, %v1763_v35  ;;  %v1768_v16 = vsub.f32 0.0, %v2126_v7  ;;  %v1770_v17 = vsub.f32 0.0, %v2130_v8 }
 0x220   :  { %2429 = vpow2.f32 %v1774_v9  ;;  %v1788_v18 = vmul.f32 1.442695, %v1767_v11  ;;  %v1792_v19 = vmul.f32 1.442695, %v1769_v13  ;;  %v548_v55 = vrot.slane %v2658_v48, %v547_v54 }
 0x221   :  { %2431 = vpow2.f32 %v1778_v10  ;;  %v1790_v20 = vmul.f32 1.442695, %v1768_v16  ;;  %v1794_v21 = vmul.f32 1.442695, %v1770_v17  ;;  %v539_v7 = vsub.s32 4, %v2610_v32 }
 0x222   :  { %2433 = vpow2.f32 %v1776_v14  ;;  %v543_v8 = vsub.s32 5, %v2610_v32 }
 0x223   :  { %2435 = vpow2.f32 %v1780_v15  ;;  %v540_v9 = vrot.slane %v2658_v48, %v539_v7 }
 0x224   :  { %2437 = vpow2.f32 %v1788_v18  ;;  %v544_v10 = vrot.slane %v2658_v48, %v543_v8 }
 0x225   :  { %2439 = vpow2.f32 %v1792_v19 }
 0x226   :  { %2441 = vpow2.f32 %v1790_v20 }
 0x227   :  { %2443 = vpow2.f32 %v1794_v21 }
 0x22a   :  { %v2430_v22 = vpop.eup %2429 }
 0x22b   :  { %v2432_v23 = vpop.eup %2431  ;;  %v1802_v24 = vadd.f32 1.0, %v2430_v22 }
 0x22c   :  { %v2434_v25 = vpop.eup %2433  ;;  %v1804_v26 = vadd.f32 1.0, %v2432_v23 }
 0x22d   :  { %v2436_v27 = vpop.eup %2435  ;;  %2445 = vrcp.f32 %v1802_v24  ;;  %v1803_v28 = vadd.f32 1.0, %v2434_v25 }
 0x22e   :  { %v2438_v29 = vpop.eup %2437  ;;  %2447 = vrcp.f32 %v1804_v26  ;;  %v1805_v30 = vadd.f32 1.0, %v2436_v27 }
 0x22f   :  { %v2440_v31 = vpop.eup %2439  ;;  %2449 = vrcp.f32 %v1803_v28  ;;  %v1809_v34 = vadd.f32 1.0, %v2438_v29 }
 0x230   :  { %v2442_v36 = vpop.eup %2441  ;;  %2451 = vrcp.f32 %v1805_v30  ;;  %v1811_v37 = vadd.f32 1.0, %v2440_v31 }
 0x231   :  { %v2444_v38 = vpop.eup %2443  ;;  %2453 = vrcp.f32 %v1809_v34  ;;  %v1810_v39 = vadd.f32 1.0, %v2442_v36 }
 0x232   :  { %2455 = vrcp.f32 %v1811_v37  ;;  %v1812_v40 = vadd.f32 1.0, %v2444_v38 }
 0x233   :  { %2457 = vrcp.f32 %v1810_v39 }
 0x234   :  { %2459 = vrcp.f32 %v1812_v40 }
 0x237   :  { %v2446_v1 = vpop.eup %2445 }
 0x238   :  { %v2448_v41 = vpop.eup %2447  ;;  %1830 = vst [vmem:[%s2724_s5] sm:$0xff] %v2446_v1 }
 0x239   :  { %v2450_v42 = vpop.eup %2449  ;;  %1832 = vst [vmem:[%s2724_s5 + $0x10] sm:$0xff] %v2448_v41 }
 0x23a   :  { %v2452_v51 = vpop.eup %2451  ;;  %1831 = vst [vmem:[%s2724_s5 + $0x8] sm:$0xff] %v2450_v42  ;;  %v2068_v43 = vpop.f32.mrb[8].mxu1 }
 0x23b   :  { %v2454_v44 = vpop.eup %2453  ;;  %1833 = vst [vmem:[%s2724_s5 + $0x18] sm:$0xff] %v2452_v51  ;;  %v2069_v45 = vpop.f32.mrb[9].mxu1 }
 0x23c   :  { %v2456_v0 = vpop.eup %2455  ;;  %1837 = vst [vmem:[%s2724_s5 + $0x38] sm:$0xff] %v2454_v44  ;;  %v2070_v47 = vadd.f32 %v2069_v45, %v2068_v43  ;;  %v2071_v49 = vpop.f32.mrb[10].mxu1 }
 0x23d   :  { %v2458_v50 = vpop.eup %2457  ;;  %1839 = vst [vmem:[%s2724_s5 + $0x48] sm:$0xff] %v2456_v0  ;;  %v2072_v53 = vpop.f32.mrb[11].mxu1 }
 0x23e   :  { %v2460_v52 = vpop.eup %2459  ;;  %1838 = vst [vmem:[%s2724_s5 + $0x40] sm:$0xff] %v2458_v50  ;;  %v2073_v12 = vadd.f32 %v2072_v53, %v2071_v49  ;;  %v1713_v56 = vadd.f32 %v2070_v47, %v548_v55 }
 0x23f   :  { %1840 = vst [vmem:[%s2724_s5 + $0x50] sm:$0xff] %v2460_v52 }
 0x240   :  { %v1716_v60 = vadd.f32 %v2073_v12, %v548_v55 }
 0x25a   :  { %v1753_v57 = vpop.f32.mrb[12].mxu1 }
 0x25b   :  { %v1754_v58 = vadd.f32 %v1753_v57, %v1713_v56  ;;  %v2121_v59 = vpop.f32.mrb[13].mxu1 }
 0x25c   :  { %v1756_v61 = vpop.f32.mrb[14].mxu1 }
 0x25d   :  { %v1766_v62 = vsub.f32 0.0, %v1754_v58  ;;  %v1757_v33 = vadd.f32 %v1756_v61, %v1716_v60  ;;  %v2122_v63 = vpop.f32.mrb[15].mxu1 }
 0x25f   :  { %v1786_v2 = vmul.f32 1.442695, %v1766_v62  ;;  %v1773_v3 = vsub.f32 0.0, %v1757_v33 }
 0x261   :  { %2461 = vpow2.f32 %v1786_v2  ;;  %v1800_v46 = vmul.f32 1.442695, %v1773_v3 }
 0x263   :  { %2463 = vpow2.f32 %v1800_v46 }
 0x26b   :  { %v2462_v4 = vpop.eup %2461 }
 0x26c   :  { %v1808_v5 = vadd.f32 1.0, %v2462_v4 }
 0x26d   :  { %v2464_v6 = vpop.eup %2463 }
 0x26e   :  { %2465 = vrcp.f32 %v1808_v5  ;;  %v1815_v35 = vadd.f32 1.0, %v2464_v6 }
 0x270   :  { %2467 = vrcp.f32 %v1815_v35 }
 0x278   :  { %v2466_v11 = vpop.eup %2465 }
 0x279   :  { %1836 = vst [vmem:[%s2724_s5 + $0x30] sm:$0xff] %v2466_v11  ;;  %v1669_v13 = vpop.f32.mrb[8].mxu0 }
 0x27a   :  { %v2468_v14 = vpop.eup %2467  ;;  %v2131_v15 = vadd.f32 %v1669_v13, %v540_v9  ;;  %v1671_v16 = vpop.f32.mrb[9].mxu0 }
 0x27b   :  { %1843 = vst [vmem:[%s2724_s5 + $0x68] sm:$0xff] %v2468_v14  ;;  %v2132_v17 = vadd.f32 %v1671_v16, %v544_v10  ;;  %v1673_v18 = vpop.f32.mrb[10].mxu0 }
 0x27c   :  { %v1764_v32 = vsub.f32 0.0, %v2131_v15  ;;  %v2133_v19 = vadd.f32 %v1673_v18, %v540_v9  ;;  %v1675_v20 = vpop.f32.mrb[11].mxu0 }
 0x27d   :  { %v1765_v21 = vsub.f32 0.0, %v2132_v17  ;;  %v2134_v48 = vadd.f32 %v1675_v20, %v544_v10 }
 0x27e   :  { %v1782_v22 = vmul.f32 1.442695, %v1764_v32  ;;  %v1771_v23 = vsub.f32 0.0, %v2133_v19 }
 0x27f   :  { %v1784_v24 = vmul.f32 1.442695, %v1765_v21  ;;  %v1772_v25 = vsub.f32 0.0, %v2134_v48 }
 0x280   :  { %2469 = vpow2.f32 %v1782_v22  ;;  %v1796_v26 = vmul.f32 1.442695, %v1771_v23 }
 0x281   :  { %2471 = vpow2.f32 %v1784_v24  ;;  %v1798_v27 = vmul.f32 1.442695, %v1772_v25 }
 0x282   :  { %2473 = vpow2.f32 %v1796_v26 }
 0x283   :  { %2475 = vpow2.f32 %v1798_v27 }
 0x28a   :  { %v2470_v28 = vpop.eup %2469 }
 0x28b   :  { %v2472_v29 = vpop.eup %2471  ;;  %v1806_v30 = vadd.f32 1.0, %v2470_v28 }
 0x28c   :  { %v2474_v31 = vpop.eup %2473  ;;  %v1807_v34 = vadd.f32 1.0, %v2472_v29 }
 0x28d   :  { %v2476_v36 = vpop.eup %2475  ;;  %2477 = vrcp.f32 %v1806_v30  ;;  %v1813_v37 = vadd.f32 1.0, %v2474_v31 }
 0x28e   :  { %2479 = vrcp.f32 %v1807_v34  ;;  %v1814_v38 = vadd.f32 1.0, %v2476_v36 }
 0x28f   :  { %2481 = vrcp.f32 %v1813_v37 }
 0x290   :  { %2483 = vrcp.f32 %v1814_v38 }
 0x297   :  { %v2478_v39 = vpop.eup %2477 }
 0x298   :  { %v2480_v40 = vpop.eup %2479  ;;  %1834 = vst [vmem:[%s2724_s5 + $0x20] sm:$0xff] %v2478_v39 }
 0x299   :  { %v2482_v1 = vpop.eup %2481  ;;  %1835 = vst [vmem:[%s2724_s5 + $0x28] sm:$0xff] %v2480_v40 }
 0x29a   :  { %v2484_v41 = vpop.eup %2483  ;;  %1841 = vst [vmem:[%s2724_s5 + $0x58] sm:$0xff] %v2482_v1 }
 0x29b   :  { %1842 = vst [vmem:[%s2724_s5 + $0x60] sm:$0xff] %v2484_v41 }
 0x29c   :  { %1848 = vsyncpa [#allocation3], 1 }
 0x29d   :  { %1849 = vsyncpa [#allocation5], 1 }

</bundles_post_ra>
